<compile_context>
chip_gen: v7x
topology: tpu7x:2x2x1
jax: 0.10.0
libtpu: 0.0.40
codegen_flags: <defaults>
</compile_context>

<pallas_src>
import functools
import math

import jax
import jax.numpy as jnp
from jax.experimental import pallas as pl
from jax.experimental.pallas import tpu as pltpu


# ---------------------------------------------------------------------------
# helpers
# ---------------------------------------------------------------------------

def _round_up(x, m):
    return (x + m - 1) // m * m


def _pad2d(x, rows, cols, dtype):
    x = x.astype(dtype)
    r, c = x.shape
    if r == rows and c == cols:
        return x
    return jnp.pad(x, ((0, rows - r), (0, cols - c)))


def _vmem_capacity_bytes():
    """Physical per-TensorCore VMEM; conservative (v7x) fallback if unknown."""
    try:
        cap = int(pltpu.get_tpu_info().vmem_capacity_bytes)
        if cap > 0:
            return cap
    except Exception:
        pass
    return 64 << 20


def _spec(block_shape, index_map, *, buffers=None):
    """BlockSpec builder; requests deeper multi-buffering when available."""
    if buffers is not None and buffers > 2 and hasattr(pl, "Buffered"):
        try:
            return pl.BlockSpec(block_shape, index_map,
                                pipeline_mode=pl.Buffered(buffers))
        except TypeError:
            pass  # older API without pipeline_mode: default double-buffering
    return pl.BlockSpec(block_shape, index_map)


# ---------------------------------------------------------------------------
# fused path: whole problem resident in VMEM, single-buffered, no grid
# ---------------------------------------------------------------------------

def _fused_kernel(*refs, order, active, has_bias):
    if has_bias:
        feat_ref, w_ref, adj_ref, bias_ref, out_ref = refs
    else:
        feat_ref, w_ref, adj_ref, out_ref = refs
        bias_ref = None

    # features @ weight: bf16 operands on the MXU, f32 accumulation.
    h = jnp.dot(feat_ref[...], w_ref[...], preferred_element_type=jnp.float32)
    if active:
        h = jnp.tanh(h)                 # f32 tanh on the EUP

    adj = adj_ref[...]                  # bf16, read from HBM exactly once
    for _ in range(order):              # `order` is a static Python int
        h = jnp.dot(adj, h.astype(jnp.bfloat16),
                    preferred_element_type=jnp.float32)

    if has_bias:
        h = h + bias_ref[...]           # f32 bias broadcast over rows
    out_ref[...] = h.astype(out_ref.dtype)


def _fused_vmem_bytes(n_pad, in_pad, out_pad, has_bias):
    """Single source of truth for the fused-path VMEM footprint estimate."""
    b = (n_pad * n_pad * 2              # adj      (bf16, single-buffered)
         + n_pad * in_pad * 2           # features (bf16)
         + in_pad * out_pad * 2         # weight   (bf16)
         + n_pad * out_pad * 4)         # f32 output
    if has_bias:
        b += 8 * out_pad * 4
    b += 6 * n_pad * out_pad * 4        # f32 h / adj@h temporaries + bf16 casts
    b += 2 << 20                        # margin
    return int(b)


def _fused_forward(feat_p, w_p, adj_p, bias_p, *, order, active, vmem_capacity):
    n_pad, in_pad = feat_p.shape
    out_pad = w_p.shape[1]
    has_bias = bias_p is not None
    operands = [feat_p, w_p, adj_p] + ([bias_p] if has_bias else [])

    vmem_bytes = _fused_vmem_bytes(n_pad, in_pad, out_pad, has_bias)
    vmem_bytes = int(min(max(vmem_bytes, 16 << 20), vmem_capacity - (4 << 20)))

    in_bytes = sum(int(x.size) * x.dtype.itemsize for x in operands)
    out_bytes = n_pad * out_pad * 4
    flops = 2 * n_pad * in_pad * out_pad + order * 2 * n_pad * n_pad * out_pad
    cost = pl.CostEstimate(
        flops=int(flops),
        transcendentals=int(n_pad * out_pad) if active else 0,
        bytes_accessed=int(in_bytes + out_bytes),
    )

    kernel = functools.partial(_fused_kernel, order=order, active=active,
                               has_bias=has_bias)
    return pl.pallas_call(
        kernel,
        out_shape=jax.ShapeDtypeStruct((n_pad, out_pad), jnp.float32),
        # no grid -> no pipeline, every operand lives once in VMEM
        in_specs=[pl.BlockSpec(memory_space=pltpu.MemorySpace.VMEM)] * len(operands),
        out_specs=pl.BlockSpec(memory_space=pltpu.MemorySpace.VMEM),
        compiler_params=pltpu.CompilerParams(vmem_limit_bytes=vmem_bytes),
        cost_estimate=cost,
    )(*operands)


# ---------------------------------------------------------------------------
# tiled path: adj streamed in tiles, h / W kept resident, row axis parallel
# ---------------------------------------------------------------------------

def _xw_kernel(feat_ref, w_ref, h_ref, acc_ref, *, active, tk, w_resident):
    k = pl.program_id(1)

    @pl.when(k == 0)
    def _():
        acc_ref[...] = jnp.zeros_like(acc_ref)

    if w_resident:
        # Whole weight lives in VMEM (constant-index block => DMA'd once);
        # slice the k-th reduction chunk in-kernel.
        w_blk = w_ref[pl.ds(pl.multiple_of(k * tk, tk), tk), :]
    else:
        w_blk = w_ref[...]
    acc_ref[...] += jnp.dot(feat_ref[...], w_blk,
                            preferred_element_type=jnp.float32)

    @pl.when(k == pl.num_programs(1) - 1)
    def _():
        h = acc_ref[...]
        if active:
            h = jnp.tanh(h)
        h_ref[...] = h.astype(h_ref.dtype)


def _xw_forward(feat_p, w_p, *, active, tm, tk, vmem_capacity):
    n_pad, in_pad = feat_p.shape
    out_pad = w_p.shape[1]
    grid = (n_pad // tm, in_pad // tk)

    w_bytes = in_pad * out_pad * 2
    w_resident = 2 * w_bytes <= vmem_capacity // 4
    if w_resident:
        w_spec = pl.BlockSpec((in_pad, out_pad), lambda i, k: (0, 0))
    else:
        w_spec = pl.BlockSpec((tk, out_pad), lambda i, k: (k, 0))

    est = (3 * tm * tk * 2
           + (2 * w_bytes if w_resident else 3 * tk * out_pad * 2)
           + 2 * tm * out_pad * 2
           + tm * out_pad * 4
           + (2 << 20))
    vmem_bytes = int(min(max(est, 32 << 20), vmem_capacity - (4 << 20)))

    cost = pl.CostEstimate(
        flops=int(2 * n_pad * in_pad * out_pad),
        transcendentals=int(n_pad * out_pad) if active else 0,
        bytes_accessed=int(feat_p.size * 2
                           + w_bytes * (1 if w_resident else grid[0])
                           + n_pad * out_pad * 2),
    )
    return pl.pallas_call(
        functools.partial(_xw_kernel, active=active, tk=tk,
                          w_resident=w_resident),
        out_shape=jax.ShapeDtypeStruct((n_pad, out_pad), jnp.bfloat16),
        grid_spec=pltpu.PrefetchScalarGridSpec(
            num_scalar_prefetch=0,
            grid=grid,
            in_specs=[
                _spec((tm, tk), lambda i, k: (i, k), buffers=3),  # feat tile
                w_spec,                                            # weight
            ],
            out_specs=pl.BlockSpec((tm, out_pad), lambda i, k: (i, 0)),
            scratch_shapes=[pltpu.VMEM((tm, out_pad), jnp.float32)],
        ),
        compiler_params=pltpu.CompilerParams(
            dimension_semantics=("parallel", "arbitrary"),
            vmem_limit_bytes=vmem_bytes),
        cost_estimate=cost,
    )(feat_p, w_p)


def _hop_kernel(*refs, add_bias, tk, h_resident):
    if add_bias:
        adj_ref, h_ref, bias_ref, out_ref, acc_ref = refs
    else:
        adj_ref, h_ref, out_ref, acc_ref = refs
        bias_ref = None
    k = pl.program_id(1)

    @pl.when(k == 0)
    def _():
        acc_ref[...] = jnp.zeros_like(acc_ref)

    if h_resident:
        # Whole h lives in VMEM (constant-index block => DMA'd once per core);
        # slice the reduction chunk in-kernel instead of re-streaming h per
        # row tile.
        h_blk = h_ref[pl.ds(pl.multiple_of(k * tk, tk), tk), :]
    else:
        h_blk = h_ref[...]
    acc_ref[...] += jnp.dot(adj_ref[...], h_blk,
                            preferred_element_type=jnp.float32)

    @pl.when(k == pl.num_programs(1) - 1)
    def _():
        r = acc_ref[...]
        if add_bias:
            r = r + bias_ref[...]
        out_ref[...] = r.astype(out_ref.dtype)


def _hop_forward(adj_p, h_p, bias_p, *, last, tm, tk, vmem_capacity):
    n_pad = adj_p.shape[0]
    out_pad = h_p.shape[1]
    add_bias = last and (bias_p is not None)
    grid = (n_pad // tm, n_pad // tk)

    h_bytes = n_pad * out_pad * 2
    h_resident = 2 * h_bytes <= vmem_capacity // 4
    if h_resident:
        h_spec = pl.BlockSpec((n_pad, out_pad), lambda i, k: (0, 0))
    else:
        h_spec = pl.BlockSpec((tk, out_pad), lambda i, k: (k, 0))

    in_specs = [
        _spec((tm, tk), lambda i, k: (i, k), buffers=3),   # adj tile (streamed)
        h_spec,                                            # h (resident if small)
    ]
    operands = [adj_p, h_p]
    if add_bias:
        in_specs.append(pl.BlockSpec((1, out_pad), lambda i, k: (0, 0)))
        operands.append(bias_p)

    out_dtype = jnp.float32 if last else jnp.bfloat16
    out_itemsize = 4 if last else 2

    est = (3 * tm * tk * 2
           + (2 * h_bytes if h_resident else 3 * tk * out_pad * 2)
           + 2 * tm * out_pad * out_itemsize
           + tm * out_pad * 4
           + (2 << 20))
    vmem_bytes = int(min(max(est, 32 << 20), vmem_capacity - (4 << 20)))

    cost = pl.CostEstimate(
        flops=int(2 * n_pad * n_pad * out_pad),
        transcendentals=0,
        bytes_accessed=int(adj_p.size * 2
                           + h_bytes * (1 if h_resident else grid[0])
                           + n_pad * out_pad * out_itemsize),
    )
    return pl.pallas_call(
        functools.partial(_hop_kernel, add_bias=add_bias, tk=tk,
                          h_resident=h_resident),
        out_shape=jax.ShapeDtypeStruct((n_pad, out_pad), out_dtype),
        grid_spec=pltpu.PrefetchScalarGridSpec(
            num_scalar_prefetch=0,
            grid=grid,
            in_specs=in_specs,
            out_specs=pl.BlockSpec((tm, out_pad), lambda i, k: (i, 0)),
            scratch_shapes=[pltpu.VMEM((tm, out_pad), jnp.float32)],
        ),
        compiler_params=pltpu.CompilerParams(
            dimension_semantics=("parallel", "arbitrary"),
            vmem_limit_bytes=vmem_bytes),
        cost_estimate=cost,
    )(*operands)


# ---------------------------------------------------------------------------
# public wrapper
# ---------------------------------------------------------------------------

def ngnn_forward(features, weight, adj, bias=None, *, order=1, active=True,
                 force_tiled=False, fused_vmem_budget=None):
    """NGNN forward: (adj^order) @ act(features @ weight) [+ bias]."""
    assert order >= 1
    n, in_f = features.shape
    out_f = weight.shape[1]
    assert weight.shape[0] == in_f and adj.shape == (n, n)

    capacity = _vmem_capacity_bytes()

    # Generation-aware fused budget: prefer the fused path (adj read from HBM
    # once, regardless of `order`) whenever it fits comfortably.  128-MiB
    # chips (v5e/v6e) get ~75% of VMEM; v7x (64 MiB) gets ~50%.
    if fused_vmem_budget is None:
        if capacity >= (96 << 20):
            fused_vmem_budget = int(0.75 * capacity)
        else:
            fused_vmem_budget = capacity // 2
    fused_vmem_budget = min(int(fused_vmem_budget), int(0.9 * capacity))

    n_al = _round_up(n, 128)
    in_al = _round_up(in_f, 128)
    out_al = _round_up(out_f, 128)
    fused_bytes = _fused_vmem_bytes(n_al, in_al, out_al, bias is not None)
    use_tiled = force_tiled or fused_bytes > fused_vmem_budget

    if not use_tiled:
        n_pad, in_pad, out_pad = n_al, in_al, out_al
        tm = tk = tk_in = None
    else:
        # Hop kernels are HBM-bound; 512-wide adj tiles amortize DMA/step
        # overhead (measured ~85% of roofline vs ~63% at 256).  A 512x512
        # bf16 tile triple-buffered is only ~0.75 MiB.
        tm = 512 if n >= 512 else (256 if n >= 256 else 128)
        tk = tm
        tk_in = 512 if in_f >= 512 else (256 if in_f >= 256 else 128)
        n_pad = _round_up(n, tm)
        in_pad = _round_up(in_f, tk_in)
        out_pad = _round_up(out_f, 128)

    # Zero padding is exact and does not change the math; padded output
    # rows/cols are sliced away below.
    feat_p = _pad2d(features, n_pad, in_pad, jnp.bfloat16)
    w_p = _pad2d(weight, in_pad, out_pad, jnp.bfloat16)
    adj_p = _pad2d(adj, n_pad, n_pad, jnp.bfloat16)
    if bias is not None:
        bias_p = _pad2d(bias.reshape(1, out_f), 1, out_pad, jnp.float32)
    else:
        bias_p = None   # statically skipped: no zero-bias array is ever DMA'd

    if not use_tiled:
        out_p = _fused_forward(feat_p, w_p, adj_p, bias_p, order=order,
                               active=active, vmem_capacity=capacity)
    else:
        h = _xw_forward(feat_p, w_p, active=active, tm=tm, tk=tk_in,
                        vmem_capacity=capacity)
        for hop in range(order):
            h = _hop_forward(adj_p, h, bias_p, last=(hop == order - 1),
                             tm=tm, tk=tk, vmem_capacity=capacity)
        out_p = h

    return out_p[:n, :out_f]


def ngnn_reference(features, weight, adj, bias, *, order=1, active=True):
    h = features @ weight
    if active:
        h = jnp.tanh(h)
    for _ in range(order):
        h = adj @ h
    return h + bias if bias is not None else h


def _make_graph(key, n, in_f, out_f):
    k_feat, k_adj, k_w, k_b = jax.random.split(key, 4)
    features = jax.random.normal(k_feat, (n, in_f), jnp.float32)
    a = jax.random.uniform(k_adj, (n, n), jnp.float32)
    a = (a + a.T) * 0.5 + jnp.eye(n, dtype=jnp.float32)      # self loops
    adj = a / jnp.sum(a, axis=1, keepdims=True)              # row-normalized
    xavier_bound = math.sqrt(6.0 / (in_f + out_f))
    weight = jax.random.uniform(k_w, (in_f, out_f), jnp.float32,
                                minval=-xavier_bound, maxval=xavier_bound)
    stdv = 1.0 / math.sqrt(out_f)
    bias = jax.random.uniform(k_b, (out_f,), jnp.float32,
                              minval=-stdv, maxval=stdv)
    return features, adj, weight, bias


if __name__ == "__main__":
    key = jax.random.PRNGKey(0)
    k_small, k_big = jax.random.split(key, 2)

    # --- small graph, module-consistent shapes: fused path --------------------
    n_nodes, in_features, out_features, order = 8, 16, 32, 2
    features, adj, weight, bias = _make_graph(k_small, n_nodes, in_features,
                                              out_features)

    ref = ngnn_reference(features, weight, adj, bias, order=order, active=True)
    out = jax.block_until_ready(
        ngnn_forward(features, weight, adj, bias, order=order, active=True))
    assert out.shape == (n_nodes, out_features)
    err = float(jnp.max(jnp.abs(out - ref)))
    assert err < 3e-2, f"fused path max abs err {err}"   # bf16 MXU inputs

    # --- no-bias / no-activation variant: exercises the static bias skip ------
    ref_nb = ngnn_reference(features, weight, adj, None, order=1, active=False)
    out_nb = jax.block_until_ready(
        ngnn_forward(features, weight, adj, None, order=1, active=False))
    err_nb = float(jnp.max(jnp.abs(out_nb - ref_nb)))
    assert err_nb < 3e-2, f"no-bias fused path max abs err {err_nb}"

    # --- medium graph forced through the streaming tiled path -----------------
    n2, in2, out2, order2 = 300, 200, 64, 2
    features2, adj2, weight2, bias2 = _make_graph(k_big, n2, in2, out2)
    ref2 = ngnn_reference(features2, weight2, adj2, bias2,
                          order=order2, active=True)
    out2_k = jax.block_until_ready(
        ngnn_forward(features2, weight2, adj2, bias2,
                     order=order2, active=True, force_tiled=True))
    assert out2_k.shape == (n2, out2)
    err2 = float(jnp.max(jnp.abs(out2_k - ref2)))
    assert err2 < 1e-1, f"tiled path max abs err {err2}"   # bf16 inputs, 2 hops

    print("KERNEL_OK")
</pallas_src>

<mosaic_0001>
module attributes {stable_mosaic.version = 11 : i64} {
  func.func @_fused_kernel(%arg0: memref<128x128xbf16, #tpu.memory_space<vmem>>, %arg1: memref<128x128xbf16, #tpu.memory_space<vmem>>, %arg2: memref<128x128xbf16, #tpu.memory_space<vmem>>, %arg3: memref<1x128xf32, #tpu.memory_space<vmem>>, %arg4: memref<128x128xf32, #tpu.memory_space<vmem>>) attributes {dimension_semantics = [], scalar_prefetch = 0 : i64, scratch_operands = 0 : i64, tpu.core_type = #tpu.core_type<tc>} {
    %c0 = arith.constant 0 : index
    %c0_0 = arith.constant 0 : index
    %0 = vector.load %arg0[%c0, %c0_0] : memref<128x128xbf16, #tpu.memory_space<vmem>>, vector<128x128xbf16>
    %c0_1 = arith.constant 0 : index
    %c0_2 = arith.constant 0 : index
    %1 = vector.load %arg1[%c0_1, %c0_2] : memref<128x128xbf16, #tpu.memory_space<vmem>>, vector<128x128xbf16>
    %cst = arith.constant dense<0.000000e+00> : vector<128x128xf32>
    %2 = tpu.matmul %0, %1, %cst {dimension_numbers = #tpu.dot_dimension_numbers<[1], [0], [0], [1], [0, 0, 1, 1], [], []>} : vector<128x128xbf16>, vector<128x128xbf16>, vector<128x128xf32> -> vector<128x128xf32>
    %3 = math.tanh %2 : vector<128x128xf32>
    %c0_3 = arith.constant 0 : index
    %c0_4 = arith.constant 0 : index
    %4 = vector.load %arg2[%c0_3, %c0_4] : memref<128x128xbf16, #tpu.memory_space<vmem>>, vector<128x128xbf16>
    %5 = arith.truncf %3 : vector<128x128xf32> to vector<128x128xbf16>
    %cst_5 = arith.constant dense<0.000000e+00> : vector<128x128xf32>
    %6 = tpu.matmul %4, %5, %cst_5 {dimension_numbers = #tpu.dot_dimension_numbers<[1], [0], [0], [1], [0, 0, 1, 1], [], []>} : vector<128x128xbf16>, vector<128x128xbf16>, vector<128x128xf32> -> vector<128x128xf32>
    %7 = arith.truncf %6 : vector<128x128xf32> to vector<128x128xbf16>
    %cst_6 = arith.constant dense<0.000000e+00> : vector<128x128xf32>
    %8 = tpu.matmul %4, %7, %cst_6 {dimension_numbers = #tpu.dot_dimension_numbers<[1], [0], [0], [1], [0, 0, 1, 1], [], []>} : vector<128x128xbf16>, vector<128x128xbf16>, vector<128x128xf32> -> vector<128x128xf32>
    %c0_7 = arith.constant 0 : index
    %c0_8 = arith.constant 0 : index
    %9 = vector.load %arg3[%c0_7, %c0_8] : memref<1x128xf32, #tpu.memory_space<vmem>>, vector<1x128xf32>
    %10 = vector.broadcast %9 : vector<1x128xf32> to vector<128x128xf32>
    %11 = arith.addf %8, %10 : vector<128x128xf32>
    %c0_9 = arith.constant 0 : index
    %c0_10 = arith.constant 0 : index
    %12 = vector.load %arg4[%c0_9, %c0_10] : memref<128x128xf32, #tpu.memory_space<vmem>>, vector<128x128xf32>
    tpu.vector_store %arg4[%c0_9, %c0_10], %11 {strides = array<i32>} : memref<128x128xf32, #tpu.memory_space<vmem>>, vector<128x128xf32>,
    return
  }
}

</mosaic_0001>

<bundles_post_ra>
// kernel: tpu_custom_call.1
= control target key start
LH: loop header
LB: loop body
LE: loop exit
PB: predicated region body
PF: predicated region fallthrough
CT: control target
= control target key end

     0   :  { %9 = vsyncpa [#allocation3], 0  ;;  %s1083_s0 = inlined_call_operand.hbm [shape: bf16[128,128], index: 0, kind: input, shape index: {}]   ;;  %s1084_s1 = inlined_call_operand.hbm [shape: bf16[128,128], index: 1, kind: input, shape index: {}]   ;;  %s1085_s2 = inlined_call_operand.hbm [shape: bf16[128,128], index: 2, kind: input, shape index: {}]   ;;  %s1086_s3 = inlined_call_operand.vmem [shape: f32[1,128], index: 3, kind: input, shape index: {}]   ;;  %s1087_s4 = inlined_call_operand.hbm [shape: f32[128,128], index: 4, kind: output, shape index: {}]  }
   0x1   :  { %10 = vsyncpa [#allocation6], 0 }
   0x2   :  { %11 = vsyncpa [#allocation4], 0  ;;  %s959_s15 = smov [#allocation5]   ;;  %s960_s17 = smov [#allocation2]  }
   0x3   :  { %s29_s16 = sshll.u32 %s959_s15, 4  ;;  %s17_s18 = sshll.u32 %s960_s17, 4  ;;  %s30_s16 = int_to_ptr.vmem [resolvable:$true] %s29_s16  ;;  %s992_s18 = int_to_ptr.vmem [resolvable:$true] %s17_s18 }
   0x4   :  { %s865_s21 = scalar_lea.hbm %s1084_s1, 1024 }
   0x5   :  { %p866_p0 = scmp.ne.s32.totalorder %s1084_s1, %s865_s21  ;;  %p869_p1 = scmp.lt.u32.totalorder %s865_s21, %s1084_s1 }
   0x7   :  { %p871_p2 = pnand %p869_p1, %p866_p0 }
   0x9   :  { %874 = shalt.err (!%p871_p2)
}
   0xa   :  { %s875_s26 = scalar_lea.vmem %s30_s16, 1024  ;;  %p880_p4 = scmp.lt.s32.totalorder %s30_s16, %s30_s16 }
   0xb   :  { %p876_p3 = scmp.ne.s32.totalorder %s30_s16, %s875_s26  ;;  %p881_p5 = scmp.lt.s32.totalorder %s875_s26, %s875_s26 }
   0xd   :  { %p882_p6 = por %p881_p5, %p880_p4 }
   0xf   :  { %p883_p7 = pnand %p882_p6, %p876_p3 }
  0x11   :  { %886 = shalt.err (!%p883_p7)
}
  0x12   :  { %s961_s27 = smov 64   ;;  %s962_s28 = smov 4  }
  0x13   :  { %35 = dma.hbm_to_vmem [thread:$0]  %s1084_s1, 1024, %s30_s16, [#allocation6], %s961_s27, %s961_s27, %s962_s28  }
  0x14   :  { %s887_s7 = scalar_lea.hbm %s1083_s0, 1024 }
  0x15   :  { %p888_p8 = scmp.ne.s32.totalorder %s1083_s0, %s887_s7  ;;  %p891_p9 = scmp.lt.u32.totalorder %s887_s7, %s1083_s0 }
  0x17   :  { %p893_p10 = pnand %p891_p9, %p888_p8 }
  0x19   :  { %896 = shalt.err (!%p893_p10)
}
  0x1a   :  { %s897_s12 = scalar_lea.vmem %s992_s18, 1024  ;;  %p902_p12 = scmp.lt.s32.totalorder %s992_s18, %s992_s18 }
  0x1b   :  { %p898_p11 = scmp.ne.s32.totalorder %s992_s18, %s897_s12  ;;  %p903_p13 = scmp.lt.s32.totalorder %s897_s12, %s897_s12 }
  0x1d   :  { %p904_p0 = por %p903_p13, %p902_p12 }
  0x1f   :  { %p905_p1 = pnand %p904_p0, %p898_p11 }
  0x21   :  { %908 = shalt.err (!%p905_p1)
}
  0x22   :  { %23 = dma.hbm_to_vmem [thread:$0]  %s1083_s0, 1024, %s992_s18, [#allocation3], %s961_s27, %s961_s27, %s962_s28  }
  0x23   :  { %s963_s14 = smov [#allocation7]   ;;  %s909_s19 = scalar_lea.hbm %s1085_s2, 1024 }
  0x24   :  { %s41_s15 = sshll.u32 %s963_s14, 4  ;;  %p910_p2 = scmp.ne.s32.totalorder %s1085_s2, %s909_s19  ;;  %s42_s15 = int_to_ptr.vmem [resolvable:$true] %s41_s15 }
  0x25   :  { %p913_p3 = scmp.lt.u32.totalorder %s909_s19, %s1085_s2 }
  0x27   :  { %p915_p4 = pnand %p913_p3, %p910_p2 }
  0x29   :  { %918 = shalt.err (!%p915_p4)
}
  0x2a   :  { %s919_s24 = scalar_lea.vmem %s42_s15, 1024  ;;  %p924_p6 = scmp.lt.s32.totalorder %s42_s15, %s42_s15 }
  0x2b   :  { %p920_p5 = scmp.ne.s32.totalorder %s42_s15, %s919_s24  ;;  %p925_p7 = scmp.lt.s32.totalorder %s919_s24, %s919_s24 }
  0x2d   :  { %p926_p8 = por %p925_p7, %p924_p6 }
  0x2f   :  { %p927_p9 = pnand %p926_p8, %p920_p5 }
  0x31   :  { %930 = shalt.err (!%p927_p9)
}
  0x32   :  { %47 = dma.hbm_to_vmem [thread:$0]  %s1085_s2, 1024, %s42_s15, [#allocation6], %s961_s27, %s961_s27, %s962_s28  }
  0x33   :  { %953 = dma.done.wait [#allocation3], 1024  }
  0x34   :  { %954 = vsyncadd [#allocation3], 4294966272 }
  0x35   :  { %955 = dma.done.wait [#allocation6], 2048  }
  0x36   :  { %956 = vsyncadd [#allocation6], 4294965248  ;;  %v809_v0 = vld [vmem:[#allocation5] sm:$0xff]   ;;  %v810_v1 = vld [vmem:[#allocation5 + $0x8] sm:$0xff]  }
  0x37   :  { %689 = vmatprep.subr.bf16.mxu0 %v809_v0  ;;  %v811_v2 = vld [vmem:[#allocation5 + $0x10] sm:$0xff]   ;;  %v812_v3 = vld [vmem:[#allocation5 + $0x18] sm:$0xff]   ;;  %v817_v4 = vld [vmem:[#allocation2] sm:$0xff]  }
  0x38   :  { %690 = vmatpush3.bf16.msra.mxu0 %v809_v0  ;;  %705 = vmatprep.mubr.bf16.mxu0 %v817_v4  ;;  %v813_v5 = vld [vmem:[#allocation5 + $0x20] sm:$0xff]   ;;  %v814_v6 = vld [vmem:[#allocation5 + $0x28] sm:$0xff]   ;;  %v815_v7 = vld [vmem:[#allocation5 + $0x30] sm:$0xff]  }
  0x39   :  { %691 = vmatprep.subr.bf16.mxu0 %v810_v1  ;;  %v816_v8 = vld [vmem:[#allocation5 + $0x38] sm:$0xff]   ;;  %v818_v9 = vld [vmem:[#allocation2 + $0x8] sm:$0xff]   ;;  %v819_v10 = vld [vmem:[#allocation2 + $0x10] sm:$0xff]  }
  0x3a   :  { %v820_v11 = vld [vmem:[#allocation2 + $0x18] sm:$0xff]   ;;  %v821_v12 = vld [vmem:[#allocation2 + $0x20] sm:$0xff]   ;;  %v822_v13 = vld [vmem:[#allocation2 + $0x28] sm:$0xff]  }
  0x3b   :  { %v823_v14 = vld [vmem:[#allocation2 + $0x30] sm:$0xff]   ;;  %v824_v15 = vld [vmem:[#allocation2 + $0x38] sm:$0xff]   ;;  %v825_v16 = vld [vmem:[#allocation7] sm:$0xff]  }
  0x3c   :  { %692 = vmatpush3.bf16.msra.mxu0 %v810_v1  ;;  %737 = vmatprep.mubr.bf16.mxu1 %v825_v16  ;;  %v1044_v57 = vld [vmem:[#allocation7 + $0x8] sm:$0xff]   ;;  %v1046_v58 = vld [vmem:[#allocation7 + $0x10] sm:$0xff]   ;;  %v1050_v59 = vld [vmem:[#allocation7 + $0x18] sm:$0xff]  }
  0x3d   :  { %693 = vmatprep.subr.bf16.mxu0 %v811_v2  ;;  %v829_v60 = vld [vmem:[#allocation7 + $0x20] sm:$0xff]   ;;  %v1053_v61 = vld [vmem:[#allocation7 + $0x28] sm:$0xff]   ;;  %v1055_v62 = vld [vmem:[#allocation7 + $0x30] sm:$0xff]  }
  0x3e   :  { %v1059_v63 = vld [vmem:[#allocation7 + $0x38] sm:$0xff]  }
  0x40   :  { %694 = vmatpush3.bf16.msra.mxu0 %v811_v2 }
  0x41   :  { %695 = vmatprep.subr.bf16.mxu0 %v812_v3 }
  0x44   :  { %696 = vmatpush3.bf16.msra.mxu0 %v812_v3 }
  0x45   :  { %697 = vmatprep.subr.bf16.mxu0 %v813_v5 }
  0x48   :  { %698 = vmatpush3.bf16.msra.mxu0 %v813_v5 }
  0x49   :  { %699 = vmatprep.subr.bf16.mxu0 %v814_v6 }
  0x4c   :  { %700 = vmatpush3.bf16.msra.mxu0 %v814_v6 }
  0x4d   :  { %701 = vmatprep.subr.bf16.mxu0 %v815_v7 }
  0x50   :  { %702 = vmatpush3.bf16.msra.mxu0 %v815_v7 }
  0x51   :  { %703 = vmatprep.subr.bf16.mxu0 %v816_v8 }
  0x54   :  { %704 = vmatpush3.bf16.msra.mxu0 %v816_v8 }
  0x57   :  { %706 = vmatmul.mubr.bf16.vlgmr.msra.gmra.mrb[0].mxu0 %v818_v9 }
  0x58   :  { %709 = vmatprep.mubr.bf16.mxu0 %v819_v10 }
  0x5f   :  { %710 = vmatmul.mubr.bf16.gmra.mrb[4].mxu0 %v820_v11 }
  0x60   :  { %713 = vmatprep.mubr.bf16.mxu0 %v821_v12 }
  0x67   :  { %714 = vmatmul.mubr.bf16.gmra.mrb[8].mxu0 %v822_v13 }
  0x68   :  { %717 = vmatprep.mubr.bf16.mxu0 %v823_v14 }
  0x6f   :  { %718 = vmatmul.mubr.bf16.gmra.mrb[12].mxu0 %v824_v15 }
  0x70   :  { %769 = vmatprep.mubr.bf16.mxu0 %v825_v16 }
 0x12a   :  { %v707_v17 = vpop.f32.mrb[0].mxu0 }
 0x12b   :  { %833 = vtanh.f32 %v707_v17  ;;  %v222_v18 = vpop.f32.mrb[1].mxu0 }
 0x12c   :  { %835 = vtanh.f32 %v222_v18  ;;  %v708_v19 = vpop.f32.mrb[2].mxu0 }
 0x12d   :  { %837 = vtanh.f32 %v708_v19  ;;  %v225_v20 = vpop.f32.mrb[3].mxu0 }
 0x12e   :  { %839 = vtanh.f32 %v225_v20 }
 0x132   :  { %v711_v21 = vpop.f32.mrb[4].mxu0 }
 0x133   :  { %841 = vtanh.f32 %v711_v21  ;;  %v238_v22 = vpop.f32.mrb[5].mxu0 }
 0x134   :  { %843 = vtanh.f32 %v238_v22  ;;  %v712_v23 = vpop.f32.mrb[6].mxu0 }
 0x135   :  { %v834_v24 = vpop.eup %833  ;;  %845 = vtanh.f32 %v712_v23  ;;  %v241_v25 = vpop.f32.mrb[7].mxu0 }
 0x136   :  { %v836_v26 = vpop.eup %835  ;;  %847 = vtanh.f32 %v241_v25 }
 0x137   :  { %v838_v27 = vpop.eup %837 }
 0x138   :  { %v840_v28 = vpop.eup %839  ;;  %v318_v29 = vpack.c.bf16 %v838_v27, %v834_v24  ;;  %v640_v24 = vld [vmem:[%s1086_s3] ss:$0 sm:$0xff]  ;;  %s964_s3 = smov [#allocation8]  }
 0x139   :  { %v317_v30 = vpack.c.bf16 %v840_v28, %v836_v26  ;;  %s603_s26 = sshll.u32 %s964_s3, 4  ;;  %s604_s26 = int_to_ptr.vmem [resolvable:$true] %s603_s26 }
 0x13a   :  { %v715_v31 = vpop.f32.mrb[8].mxu0  ;;  %s931_s27 = scalar_lea.vmem %s604_s26, 2048  ;;  %p936_p11 = scmp.lt.s32.totalorder %s604_s26, %s604_s26 }
 0x13b   :  { %849 = vtanh.f32 %v715_v31  ;;  %v254_v32 = vpop.f32.mrb[9].mxu0  ;;  %721 = vmatprep.subr.bf16.mxu1 %v317_v30  ;;  %p932_p10 = scmp.ne.s32.totalorder %s604_s26, %s931_s27  ;;  %p937_p12 = scmp.lt.s32.totalorder %s931_s27, %s931_s27 }
 0x13c   :  { %851 = vtanh.f32 %v254_v32  ;;  %v716_v33 = vpop.f32.mrb[10].mxu0  ;;  %722 = vmatpush3.bf16.msra.mxu1 %v317_v30 }
 0x13d   :  { %v842_v34 = vpop.eup %841  ;;  %853 = vtanh.f32 %v716_v33  ;;  %v257_v35 = vpop.f32.mrb[11].mxu0  ;;  %723 = vmatprep.subr.bf16.mxu1 %v318_v29  ;;  %p938_p13 = por %p937_p12, %p936_p11 }
 0x13e   :  { %v844_v36 = vpop.eup %843  ;;  %855 = vtanh.f32 %v257_v35 }
 0x13f   :  { %v846_v37 = vpop.eup %845  ;;  %p939_p0 = pnand %p938_p13, %p932_p10 }
 0x140   :  { %v848_v38 = vpop.eup %847  ;;  %724 = vmatpush3.bf16.msra.mxu1 %v318_v29  ;;  %v320_v39 = vpack.c.bf16 %v846_v37, %v842_v34 }
 0x141   :  { %v319_v40 = vpack.c.bf16 %v848_v38, %v844_v36 }
 0x142   :  { %v719_v41 = vpop.f32.mrb[12].mxu0 }
 0x143   :  { %857 = vtanh.f32 %v719_v41  ;;  %v270_v42 = vpop.f32.mrb[13].mxu0  ;;  %725 = vmatprep.subr.bf16.mxu1 %v319_v40 }
 0x144   :  { %859 = vtanh.f32 %v270_v42  ;;  %v720_v43 = vpop.f32.mrb[14].mxu0  ;;  %726 = vmatpush3.bf16.msra.mxu1 %v319_v40 }
 0x145   :  { %v850_v44 = vpop.eup %849  ;;  %861 = vtanh.f32 %v720_v43  ;;  %v273_v45 = vpop.f32.mrb[15].mxu0  ;;  %727 = vmatprep.subr.bf16.mxu1 %v320_v39 }
 0x146   :  { %v852_v46 = vpop.eup %851  ;;  %863 = vtanh.f32 %v273_v45 }
 0x147   :  { %v854_v47 = vpop.eup %853 }
 0x148   :  { %v856_v48 = vpop.eup %855  ;;  %728 = vmatpush3.bf16.msra.mxu1 %v320_v39  ;;  %v322_v49 = vpack.c.bf16 %v854_v47, %v850_v44 }
 0x149   :  { %v321_v50 = vpack.c.bf16 %v856_v48, %v852_v46 }
 0x14b   :  { %729 = vmatprep.subr.bf16.mxu1 %v321_v50 }
 0x14c   :  { %730 = vmatpush3.bf16.msra.mxu1 %v321_v50 }
 0x14d   :  { %v858_v51 = vpop.eup %857  ;;  %731 = vmatprep.subr.bf16.mxu1 %v322_v49 }
 0x14e   :  { %v860_v52 = vpop.eup %859 }
 0x14f   :  { %v862_v53 = vpop.eup %861 }
 0x150   :  { %v864_v54 = vpop.eup %863  ;;  %732 = vmatpush3.bf16.msra.mxu1 %v322_v49  ;;  %v324_v55 = vpack.c.bf16 %v862_v53, %v858_v51 }
 0x151   :  { %v323_v56 = vpack.c.bf16 %v864_v54, %v860_v52 }
 0x153   :  { %733 = vmatprep.subr.bf16.mxu1 %v323_v56 }
 0x154   :  { %734 = vmatpush3.bf16.msra.mxu1 %v323_v56 }
 0x155   :  { %735 = vmatprep.subr.bf16.mxu1 %v324_v55 }
 0x158   :  { %736 = vmatpush3.bf16.msra.mxu1 %v324_v55 }
 0x15b   :  { %738 = vmatmul.mubr.bf16.vlgmr.msra.gmra.mrb[0].mxu1 %v1044_v57 }
 0x15c   :  { %741 = vmatprep.mubr.bf16.mxu1 %v1046_v58 }
 0x163   :  { %742 = vmatmul.mubr.bf16.gmra.mrb[4].mxu1 %v1050_v59 }
 0x164   :  { %745 = vmatprep.mubr.bf16.mxu1 %v829_v60 }
 0x16b   :  { %746 = vmatmul.mubr.bf16.gmra.mrb[8].mxu1 %v1053_v61 }
 0x16c   :  { %749 = vmatprep.mubr.bf16.mxu1 %v1055_v62 }
 0x173   :  { %750 = vmatmul.mubr.bf16.gmra.mrb[12].mxu1 %v1059_v63 }
 0x174   :  { %777 = vmatprep.mubr.bf16.mxu1 %v829_v60 }
 0x22e   :  { %v739_v0 = vpop.f32.mrb[0].mxu1 }
 0x22f   :  { %v407_v1 = vpop.f32.mrb[1].mxu1 }
 0x230   :  { %v740_v2 = vpop.f32.mrb[2].mxu1 }
 0x231   :  { %v471_v3 = vpack.c.bf16 %v740_v2, %v739_v0  ;;  %v410_v4 = vpop.f32.mrb[3].mxu1 }
 0x232   :  { %v470_v5 = vpack.c.bf16 %v410_v4, %v407_v1 }
 0x234   :  { %753 = vmatprep.subr.bf16.mxu0 %v470_v5  ;;  %785 = vmatprep.subr.bf16.mxu1 %v470_v5 }
 0x235   :  { %754 = vmatpush3.bf16.msra.mxu0 %v470_v5  ;;  %793 = vmatpush3.bf16.msra.mxu1 %v470_v5 }
 0x236   :  { %v743_v6 = vpop.f32.mrb[4].mxu1  ;;  %755 = vmatprep.subr.bf16.mxu0 %v471_v3  ;;  %786 = vmatprep.subr.bf16.mxu1 %v471_v3 }
 0x237   :  { %v423_v7 = vpop.f32.mrb[5].mxu1 }
 0x238   :  { %v744_v8 = vpop.f32.mrb[6].mxu1 }
 0x239   :  { %v473_v9 = vpack.c.bf16 %v744_v8, %v743_v6  ;;  %v426_v10 = vpop.f32.mrb[7].mxu1  ;;  %756 = vmatpush3.bf16.msra.mxu0 %v471_v3  ;;  %794 = vmatpush3.bf16.msra.mxu1 %v471_v3 }
 0x23a   :  { %v472_v11 = vpack.c.bf16 %v426_v10, %v423_v7 }
 0x23c   :  { %757 = vmatprep.subr.bf16.mxu0 %v472_v11  ;;  %787 = vmatprep.subr.bf16.mxu1 %v472_v11 }
 0x23d   :  { %758 = vmatpush3.bf16.msra.mxu0 %v472_v11  ;;  %795 = vmatpush3.bf16.msra.mxu1 %v472_v11 }
 0x23e   :  { %v747_v12 = vpop.f32.mrb[8].mxu1  ;;  %759 = vmatprep.subr.bf16.mxu0 %v473_v9  ;;  %788 = vmatprep.subr.bf16.mxu1 %v473_v9 }
 0x23f   :  { %v439_v13 = vpop.f32.mrb[9].mxu1 }
 0x240   :  { %v748_v14 = vpop.f32.mrb[10].mxu1 }
 0x241   :  { %v475_v15 = vpack.c.bf16 %v748_v14, %v747_v12  ;;  %v442_v16 = vpop.f32.mrb[11].mxu1  ;;  %760 = vmatpush3.bf16.msra.mxu0 %v473_v9  ;;  %796 = vmatpush3.bf16.msra.mxu1 %v473_v9 }
 0x242   :  { %v474_v17 = vpack.c.bf16 %v442_v16, %v439_v13 }
 0x244   :  { %761 = vmatprep.subr.bf16.mxu0 %v474_v17  ;;  %789 = vmatprep.subr.bf16.mxu1 %v474_v17 }
 0x245   :  { %762 = vmatpush3.bf16.msra.mxu0 %v474_v17  ;;  %797 = vmatpush3.bf16.msra.mxu1 %v474_v17 }
 0x246   :  { %v751_v18 = vpop.f32.mrb[12].mxu1  ;;  %763 = vmatprep.subr.bf16.mxu0 %v475_v15  ;;  %790 = vmatprep.subr.bf16.mxu1 %v475_v15 }
 0x247   :  { %v455_v19 = vpop.f32.mrb[13].mxu1 }
 0x248   :  { %v752_v20 = vpop.f32.mrb[14].mxu1 }
 0x249   :  { %v477_v21 = vpack.c.bf16 %v752_v20, %v751_v18  ;;  %v458_v22 = vpop.f32.mrb[15].mxu1  ;;  %764 = vmatpush3.bf16.msra.mxu0 %v475_v15  ;;  %798 = vmatpush3.bf16.msra.mxu1 %v475_v15 }
 0x24a   :  { %v476_v23 = vpack.c.bf16 %v458_v22, %v455_v19 }
 0x24c   :  { %765 = vmatprep.subr.bf16.mxu0 %v476_v23  ;;  %791 = vmatprep.subr.bf16.mxu1 %v476_v23 }
 0x24d   :  { %766 = vmatpush3.bf16.msra.mxu0 %v476_v23  ;;  %799 = vmatpush3.bf16.msra.mxu1 %v476_v23 }
 0x24e   :  { %767 = vmatprep.subr.bf16.mxu0 %v477_v21  ;;  %792 = vmatprep.subr.bf16.mxu1 %v477_v21 }
 0x251   :  { %768 = vmatpush3.bf16.msra.mxu0 %v477_v21  ;;  %800 = vmatpush3.bf16.msra.mxu1 %v477_v21 }
 0x254   :  { %770 = vmatmul.mubr.bf16.vlgmr.msra.gmra.mrb[16].mxu0 %v1044_v57  ;;  %778 = vmatmul.mubr.bf16.vlgmr.msra.gmra.mrb[16].mxu1 %v1053_v61 }
 0x255   :  { %773 = vmatprep.mubr.bf16.mxu0 %v1046_v58  ;;  %781 = vmatprep.mubr.bf16.mxu1 %v1055_v62 }
 0x25c   :  { %774 = vmatmul.mubr.bf16.gmra.mrb[20].mxu0 %v1050_v59  ;;  %782 = vmatmul.mubr.bf16.gmra.mrb[20].mxu1 %v1059_v63 }
 0x327   :  { %v771_v25 = vpop.f32.mrb[16].mxu0  ;;  %v779_v26 = vpop.f32.mrb[16].mxu1 }
 0x328   :  { %v528_v27 = vadd.f32 %v771_v25, %v640_v24  ;;  %v560_v28 = vadd.f32 %v779_v26, %v640_v24  ;;  %v519_v29 = vpop.f32.mrb[17].mxu0  ;;  %v551_v30 = vpop.f32.mrb[17].mxu1 }
 0x329   :  { %v520_v31 = vadd.f32 %v640_v24, %v519_v29  ;;  %v552_v32 = vadd.f32 %v640_v24, %v551_v30  ;;  %v772_v33 = vpop.f32.mrb[18].mxu0  ;;  %v780_v34 = vpop.f32.mrb[18].mxu1 }
 0x32a   :  { %584 = vst [vmem:[#allocation8 + $0x10] sm:$0xff] %v528_v27  ;;  %592 = vst [vmem:[#allocation8 + $0x50] sm:$0xff] %v560_v28  ;;  %v531_v35 = vadd.f32 %v772_v33, %v640_v24  ;;  %v563_v36 = vadd.f32 %v780_v34, %v640_v24  ;;  %v522_v37 = vpop.f32.mrb[19].mxu0  ;;  %v554_v38 = vpop.f32.mrb[19].mxu1 }
 0x32b   :  { %582 = vst [vmem:[#allocation8] sm:$0xff] %v520_v31  ;;  %590 = vst [vmem:[#allocation8 + $0x40] sm:$0xff] %v552_v32  ;;  %v523_v39 = vadd.f32 %v640_v24, %v522_v37  ;;  %v555_v40 = vadd.f32 %v640_v24, %v554_v38 }
 0x32c   :  { %585 = vst [vmem:[#allocation8 + $0x18] sm:$0xff] %v531_v35  ;;  %593 = vst [vmem:[#allocation8 + $0x58] sm:$0xff] %v563_v36 }
 0x32d   :  { %583 = vst [vmem:[#allocation8 + $0x8] sm:$0xff] %v523_v39  ;;  %591 = vst [vmem:[#allocation8 + $0x48] sm:$0xff] %v555_v40 }
 0x32f   :  { %v775_v41 = vpop.f32.mrb[20].mxu0  ;;  %v783_v42 = vpop.f32.mrb[20].mxu1 }
 0x330   :  { %v544_v43 = vadd.f32 %v775_v41, %v640_v24  ;;  %v576_v44 = vadd.f32 %v783_v42, %v640_v24  ;;  %v535_v45 = vpop.f32.mrb[21].mxu0  ;;  %v567_v46 = vpop.f32.mrb[21].mxu1 }
 0x331   :  { %v536_v47 = vadd.f32 %v640_v24, %v535_v45  ;;  %v568_v48 = vadd.f32 %v640_v24, %v567_v46  ;;  %v776_v49 = vpop.f32.mrb[22].mxu0  ;;  %v784_v50 = vpop.f32.mrb[22].mxu1 }
 0x332   :  { %588 = vst [vmem:[#allocation8 + $0x30] sm:$0xff] %v544_v43  ;;  %596 = vst [vmem:[#allocation8 + $0x70] sm:$0xff] %v576_v44  ;;  %v547_v51 = vadd.f32 %v776_v49, %v640_v24  ;;  %v579_v52 = vadd.f32 %v784_v50, %v640_v24  ;;  %v538_v53 = vpop.f32.mrb[23].mxu0  ;;  %v570_v54 = vpop.f32.mrb[23].mxu1 }
 0x333   :  { %586 = vst [vmem:[#allocation8 + $0x20] sm:$0xff] %v536_v47  ;;  %594 = vst [vmem:[#allocation8 + $0x60] sm:$0xff] %v568_v48  ;;  %v539_v55 = vadd.f32 %v640_v24, %v538_v53  ;;  %v571_v56 = vadd.f32 %v640_v24, %v570_v54 }
 0x334   :  { %589 = vst [vmem:[#allocation8 + $0x38] sm:$0xff] %v547_v51  ;;  %597 = vst [vmem:[#allocation8 + $0x78] sm:$0xff] %v579_v52 }
 0x335   :  { %587 = vst [vmem:[#allocation8 + $0x28] sm:$0xff] %v539_v55  ;;  %595 = vst [vmem:[#allocation8 + $0x68] sm:$0xff] %v571_v56 }
 0x336   :  { %942 = shalt.err (!%p939_p0)
}
 0x337   :  { %s943_s30 = scalar_lea.hbm %s1087_s4, 2048 }
 0x338   :  { %p944_p1 = scmp.ne.s32.totalorder %s1087_s4, %s943_s30  ;;  %p947_p2 = scmp.lt.u32.totalorder %s943_s30, %s1087_s4 }
 0x33a   :  { %p949_p3 = pnand %p947_p2, %p944_p1 }
 0x33c   :  { %952 = shalt.err (!%p949_p3)
}
 0x33d   :  { %s965_s9 = smov 128   ;;  %s966_s10 = smov 8  }
 0x33e   :  { %609 = dma.vmem_to_hbm [thread:$0]  %s604_s26, 2048, %s1087_s4, [#allocation4], %s965_s9, %s965_s9, %s966_s10  }
 0x33f   :  { %957 = dma.done.wait [#allocation4], 2048  }
 0x340   :  { %958 = vsyncadd [#allocation4], 4294965248 }
 0x341   :  { %613 = vsyncpa [#allocation3], 1 }
 0x342   :  { %614 = vsyncpa [#allocation6], 1 }
 0x343   :  { %615 = vsyncpa [#allocation4], 1 }

</bundles_post_ra>
